<compile_context>
chip_gen: v6e
topology: v6e:2x2x1
jax: 0.10.0
libtpu: 0.0.40
codegen_flags: <defaults>
</compile_context>

<pallas_src>
import functools

import jax
import jax.numpy as jnp
from jax.experimental import pallas as pl
from jax.experimental.pallas import tpu as pltpu

_HI = jax.lax.Precision.HIGHEST  # exact f32 MXU passes for the one-hot dots


def _round_up(x, m):
    return ((x + m - 1) // m) * m


def _vmem_capacity_bytes():
    try:
        return int(pltpu.get_tpu_info().vmem_capacity_bytes)
    except Exception:
        return 64 * 1024 * 1024  # conservative fallback (v7x per-TC VMEM)


def _layernorm_rows_kernel(x_ref, a_ref, b_ref, o_ref, *, eps, d_model):
    """General path: one row per normalization group, reduce over last axis."""
    x = x_ref[...].astype(jnp.float32)                      # (R, d_model)
    mean = jnp.mean(x, axis=-1, keepdims=True)
    diff = x - mean
    var = jnp.sum(diff * diff, axis=-1, keepdims=True) * (1.0 / (d_model - 1))
    # Column-wise reciprocal (narrow (R,1)) instead of a full-tile divide.
    inv = pl.reciprocal(jnp.sqrt(var) + eps, approx=False)
    a = a_ref[...].astype(jnp.float32)
    b = b_ref[...].astype(jnp.float32)
    o_ref[...] = (diff * inv * a + b).astype(o_ref.dtype)


def _layernorm_packed_kernel(x_ref, a_ref, b_ref, seg_ref, segt_ref, o_ref,
                             *, eps, d_model):
    """Lane-dense path: `pack` logical rows packed into one 128-wide row.

    Segmented reductions over each d_model-wide lane segment are matmuls with
    a one-hot (128, pack) segment matrix on the otherwise-idle MXU; the
    per-segment statistics are broadcast back across lanes with the transpose.
    """
    x = x_ref[...].astype(jnp.float32)                      # (R, 128)
    seg = seg_ref[...]                                       # (128, pack)
    segt = segt_ref[...]                                     # (pack, 128)

    sums = jnp.dot(x, seg, preferred_element_type=jnp.float32, precision=_HI)
    mean = sums * (1.0 / d_model)                            # (R, pack)
    mean_full = jnp.dot(mean, segt, preferred_element_type=jnp.float32,
                        precision=_HI)                       # (R, 128)
    diff = x - mean_full
    ssq = jnp.dot(diff * diff, seg, preferred_element_type=jnp.float32,
                  precision=_HI)                             # (R, pack)
    var = ssq * (1.0 / (d_model - 1))
    inv = pl.reciprocal(jnp.sqrt(var) + eps, approx=False)   # (R, pack)
    inv_full = jnp.dot(inv, segt, preferred_element_type=jnp.float32,
                       precision=_HI)                        # (R, 128)

    a = a_ref[...].astype(jnp.float32)
    b = b_ref[...].astype(jnp.float32)
    o_ref[...] = (diff * inv_full * a + b).astype(o_ref.dtype)


def layernorm(x, a2, b2, eps=1e-6, block_rows=None):
    """x: (..., d_model); a2, b2: (d_model,). Normalizes over the last axis."""
    orig_shape = x.shape
    d_model = orig_shape[-1]
    assert d_model > 1, "unbiased std divides by (d_model - 1); need d_model > 1"
    out_dtype = x.dtype

    x2d = x.reshape(-1, d_model)        # free metadata-only reshape
    n_rows = x2d.shape[0]

    # Lane-dense packing when the feature dim is narrower than a vreg's lanes,
    # but only when the reshape is a free bitcast (no whole-tensor pad copy).
    pack = 128 // d_model if (d_model < 128 and 128 % d_model == 0) else 1
    if pack > 1 and n_rows % pack != 0:
        pack = 1   # remainder would need a full-tensor pad; rows path is cheaper

    if pack > 1:
        n_packed = n_rows // pack
        width = d_model * pack                               # == 128
        x_in = x2d.reshape(n_packed, width)                  # free bitcast
        a_in = jnp.tile(a2.reshape(1, d_model), (1, pack))
        b_in = jnp.tile(b2.reshape(1, d_model), (1, pack))
        lanes = jnp.arange(width, dtype=jnp.int32)
        segids = jnp.arange(pack, dtype=jnp.int32)
        seg = (lanes[:, None] // d_model == segids[None, :]).astype(jnp.float32)
        seg_t = seg.T
    else:
        n_packed = n_rows
        width = d_model
        x_in = x2d
        a_in = a2.reshape(1, d_model)
        b_in = b2.reshape(1, d_model)

    itemsize = jnp.dtype(out_dtype).itemsize
    sub = max(8, 32 // itemsize)           # sublane packing: 8 f32, 16 bf16

    # Per-generation VMEM budget: 3/4 of physical, capped at 96 MiB
    # (=> 96 MiB on v5e/v6e's 128 MiB, 48 MiB on v7x's 64 MiB).
    vmem_cap = _vmem_capacity_bytes()
    vmem_limit = int(min((vmem_cap * 3) // 4, 96 * 1024 * 1024))

    if block_rows is None:
        # One f32-equivalent tile ~ vmem_limit/8: covers 2x double-buffered
        # input + output tiles plus ~3 in-kernel f32 scratch copies of the
        # tile, with headroom for compiler scratch.
        tile_budget = vmem_limit // 8
        block_rows = (tile_budget // (width * 4)) // sub * sub

    block_rows = int(block_rows)
    # Keep >= 4 grid steps when there is enough work so the DMA pipeline has
    # depth and the 'parallel' row axis can shard across v7x's two TCs.
    block_rows = min(block_rows, _round_up(pl.cdiv(n_packed, 4), sub))
    block_rows = max(sub, (block_rows // sub) * sub)
    if block_rows >= n_packed:
        block_rows = n_packed          # single full-extent block (always legal)
    grid = (pl.cdiv(n_packed, block_rows),)   # no wrapper pad; edge blocks masked

    row_in_spec = pl.BlockSpec((block_rows, width), lambda i: (i, 0))
    out_spec = pl.BlockSpec((block_rows, width), lambda i: (i, 0))
    vec_spec = pl.BlockSpec((1, width), lambda i: (0, 0))

    if pack > 1:
        kernel = functools.partial(_layernorm_packed_kernel,
                                   eps=eps, d_model=d_model)
        in_specs = [
            row_in_spec, vec_spec, vec_spec,
            pl.BlockSpec((width, pack), lambda i: (0, 0)),
            pl.BlockSpec((pack, width), lambda i: (0, 0)),
        ]
        args = (x_in, a_in, b_in, seg, seg_t)
    else:
        kernel = functools.partial(_layernorm_rows_kernel,
                                   eps=eps, d_model=d_model)
        in_specs = [row_in_spec, vec_spec, vec_spec]
        args = (x_in, a_in, b_in)

    n_elems = n_packed * width
    cost = pl.CostEstimate(
        flops=8 * n_elems,                     # sub, sq, mul-by-inv, scale, shift, reduces
        transcendentals=2 * n_packed * pack,   # sqrt + reciprocal per logical row
        bytes_accessed=2 * n_elems * itemsize + 2 * width * 4,
    )

    out = pl.pallas_call(
        kernel,
        out_shape=jax.ShapeDtypeStruct((n_packed, width), out_dtype),
        grid_spec=pltpu.PrefetchScalarGridSpec(
            num_scalar_prefetch=0,
            grid=grid,
            in_specs=in_specs,
            out_specs=out_spec,
        ),
        compiler_params=pltpu.CompilerParams(
            dimension_semantics=("parallel",),   # shards rows across v7x TCs
            vmem_limit_bytes=vmem_limit,
        ),
        cost_estimate=cost,
    )(*args)

    if pack > 1:
        out = out.reshape(n_rows, d_model)      # free bitcast back
    return out.reshape(orig_shape)


def _reference(x, a2, b2, eps):
    # Same math as the PyTorch module (unbiased N-1 variance, eps added to std).
    d = x.shape[-1]
    mean = jnp.mean(x, axis=-1, keepdims=True)
    std = jnp.sqrt(jnp.sum((x - mean) ** 2, axis=-1, keepdims=True) / (d - 1))
    return a2 * (x - mean) / (std + eps) + b2


if __name__ == "__main__":
    key = jax.random.PRNGKey(0)
    k1, k2, k3 = jax.random.split(key, 3)

    # config.d_model = 32; GPT-style input (batch, seq, d_model) -> packed path.
    batch, seq, d_model = 2, 8, 32
    x = jax.random.normal(k1, (batch, seq, d_model), dtype=jnp.float32)
    a2 = jnp.ones((d_model,), dtype=jnp.float32)
    b2 = jnp.ones((d_model,), dtype=jnp.float32)
    out = jax.block_until_ready(layernorm(x, a2, b2, eps=1e-6))
    ref = _reference(x, a2, b2, 1e-6)
    assert jnp.allclose(out, ref, atol=1e-5, rtol=1e-5), "packed-path mismatch"

    # General rows path (lane-dense width), with a non-divisible row count to
    # exercise the pad-free masked edge block: 3*5 = 15 rows, block_rows = 8.
    d2 = 256
    x2 = jax.random.normal(k2, (3, 5, d2), dtype=jnp.float32)
    a22 = jnp.ones((d2,), dtype=jnp.float32)
    b22 = jnp.ones((d2,), dtype=jnp.float32)
    out2 = jax.block_until_ready(layernorm(x2, a22, b22, eps=1e-6))
    ref2 = _reference(x2, a22, b22, 1e-6)
    assert jnp.allclose(out2, ref2, atol=1e-5, rtol=1e-5), "rows-path mismatch"

    # Narrow width whose row count is not a multiple of pack -> rows fallback
    # (no whole-tensor pad copies anywhere).
    x3 = jax.random.normal(k3, (10, d_model), dtype=jnp.float32)
    out3 = jax.block_until_ready(layernorm(x3, a2, b2, eps=1e-6))
    ref3 = _reference(x3, a2, b2, 1e-6)
    assert jnp.allclose(out3, ref3, atol=1e-5, rtol=1e-5), "fallback-path mismatch"

    print("KERNEL_OK")
</pallas_src>

<mosaic_0001>
module attributes {stable_mosaic.version = 11 : i64} {
  func.func @_layernorm_packed_kernel(%arg0: i32, %arg1: memref<4x128xf32, #tpu.memory_space<vmem>>, %arg2: memref<1x128xf32, #tpu.memory_space<vmem>>, %arg3: memref<1x128xf32, #tpu.memory_space<vmem>>, %arg4: memref<128x4xf32, #tpu.memory_space<vmem>>, %arg5: memref<4x128xf32, #tpu.memory_space<vmem>>, %arg6: memref<4x128xf32, #tpu.memory_space<vmem>>) attributes {dimension_semantics = [#tpu.dimension_semantics<parallel>], iteration_bounds = array<i64: 1>, scalar_prefetch = 0 : i64, scratch_operands = 0 : i64, tpu.core_type = #tpu.core_type<tc>, window_params = [{transform_indices = @transform_0, window_bounds = array<i64: 4, 128>}, {pipeline_mode = #tpu.pipeline_mode<synchronous>, transform_indices = @transform_1, window_bounds = array<i64: 1, 128>}, {pipeline_mode = #tpu.pipeline_mode<synchronous>, transform_indices = @transform_2, window_bounds = array<i64: 1, 128>}, {pipeline_mode = #tpu.pipeline_mode<synchronous>, transform_indices = @transform_3, window_bounds = array<i64: 128, 4>}, {pipeline_mode = #tpu.pipeline_mode<synchronous>, transform_indices = @transform_4, window_bounds = array<i64: 4, 128>}, {transform_indices = @transform_5, window_bounds = array<i64: 4, 128>}]} {
    %c0 = arith.constant 0 : index
    %c0_0 = arith.constant 0 : index
    %0 = vector.load %arg1[%c0, %c0_0] : memref<4x128xf32, #tpu.memory_space<vmem>>, vector<4x128xf32>
    %c0_1 = arith.constant 0 : index
    %c0_2 = arith.constant 0 : index
    %1 = vector.load %arg4[%c0_1, %c0_2] : memref<128x4xf32, #tpu.memory_space<vmem>>, vector<128x4xf32>
    %c0_3 = arith.constant 0 : index
    %c0_4 = arith.constant 0 : index
    %2 = vector.load %arg5[%c0_3, %c0_4] : memref<4x128xf32, #tpu.memory_space<vmem>>, vector<4x128xf32>
    %cst = arith.constant dense<0.000000e+00> : vector<4x4xf32>
    %3 = tpu.matmul %0, %1, %cst {dimension_numbers = #tpu.dot_dimension_numbers<[1], [0], [0], [1], [0, 0, 1, 1], [], []>, precision = #tpu.contract_precision<fp32>} : vector<4x128xf32>, vector<128x4xf32>, vector<4x4xf32> -> vector<4x4xf32>
    %cst_5 = arith.constant 3.125000e-02 : f32
    %4 = vector.broadcast %cst_5 : f32 to vector<4x4xf32>
    %5 = arith.mulf %3, %4 : vector<4x4xf32>
    %cst_6 = arith.constant dense<0.000000e+00> : vector<4x128xf32>
    %6 = tpu.matmul %5, %2, %cst_6 {dimension_numbers = #tpu.dot_dimension_numbers<[1], [0], [0], [1], [0, 0, 1, 1], [], []>, precision = #tpu.contract_precision<fp32>} : vector<4x4xf32>, vector<4x128xf32>, vector<4x128xf32> -> vector<4x128xf32>
    %7 = arith.subf %0, %6 : vector<4x128xf32>
    %8 = arith.mulf %7, %7 : vector<4x128xf32>
    %cst_7 = arith.constant dense<0.000000e+00> : vector<4x4xf32>
    %9 = tpu.matmul %8, %1, %cst_7 {dimension_numbers = #tpu.dot_dimension_numbers<[1], [0], [0], [1], [0, 0, 1, 1], [], []>, precision = #tpu.contract_precision<fp32>} : vector<4x128xf32>, vector<128x4xf32>, vector<4x4xf32> -> vector<4x4xf32>
    %cst_8 = arith.constant 0.0322580636 : f32
    %10 = vector.broadcast %cst_8 : f32 to vector<4x4xf32>
    %11 = arith.mulf %9, %10 : vector<4x4xf32>
    %12 = math.sqrt %11 : vector<4x4xf32>
    %cst_9 = arith.constant 9.99999997E-7 : f32
    %13 = vector.broadcast %cst_9 : f32 to vector<4x4xf32>
    %14 = arith.addf %12, %13 : vector<4x4xf32>
    %15 = tpu.reciprocal %14 : vector<4x4xf32> -> vector<4x4xf32>
    %cst_10 = arith.constant dense<0.000000e+00> : vector<4x128xf32>
    %16 = tpu.matmul %15, %2, %cst_10 {dimension_numbers = #tpu.dot_dimension_numbers<[1], [0], [0], [1], [0, 0, 1, 1], [], []>, precision = #tpu.contract_precision<fp32>} : vector<4x4xf32>, vector<4x128xf32>, vector<4x128xf32> -> vector<4x128xf32>
    %c0_11 = arith.constant 0 : index
    %c0_12 = arith.constant 0 : index
    %17 = vector.load %arg2[%c0_11, %c0_12] : memref<1x128xf32, #tpu.memory_space<vmem>>, vector<1x128xf32>
    %c0_13 = arith.constant 0 : index
    %c0_14 = arith.constant 0 : index
    %18 = vector.load %arg3[%c0_13, %c0_14] : memref<1x128xf32, #tpu.memory_space<vmem>>, vector<1x128xf32>
    %19 = arith.mulf %7, %16 : vector<4x128xf32>
    %20 = vector.broadcast %17 : vector<1x128xf32> to vector<4x128xf32>
    %21 = arith.mulf %19, %20 : vector<4x128xf32>
    %22 = vector.broadcast %18 : vector<1x128xf32> to vector<4x128xf32>
    %23 = arith.addf %21, %22 : vector<4x128xf32>
    %c0_15 = arith.constant 0 : index
    %c0_16 = arith.constant 0 : index
    %24 = vector.load %arg6[%c0_15, %c0_16] : memref<4x128xf32, #tpu.memory_space<vmem>>, vector<4x128xf32>
    tpu.vector_store %arg6[%c0_15, %c0_16], %23 {strides = array<i32>} : memref<4x128xf32, #tpu.memory_space<vmem>>, vector<4x128xf32>,
    return
  }
  func.func @transform_0(%arg0: i32) -> (i32, i32) {
    %c0_i32 = arith.constant 0 : i32
    %c0_i32_0 = arith.constant 0 : i32
    return %arg0, %c0_i32 : i32, i32
  }
  func.func @transform_1(%arg0: i32) -> (i32, i32) {
    %c0_i32 = arith.constant 0 : i32
    %c0_i32_0 = arith.constant 0 : i32
    %c0_i32_1 = arith.constant 0 : i32
    return %c0_i32, %c0_i32_0 : i32, i32
  }
  func.func @transform_2(%arg0: i32) -> (i32, i32) {
    %c0_i32 = arith.constant 0 : i32
    %c0_i32_0 = arith.constant 0 : i32
    %c0_i32_1 = arith.constant 0 : i32
    return %c0_i32, %c0_i32_0 : i32, i32
  }
  func.func @transform_3(%arg0: i32) -> (i32, i32) {
    %c0_i32 = arith.constant 0 : i32
    %c0_i32_0 = arith.constant 0 : i32
    %c0_i32_1 = arith.constant 0 : i32
    return %c0_i32, %c0_i32_0 : i32, i32
  }
  func.func @transform_4(%arg0: i32) -> (i32, i32) {
    %c0_i32 = arith.constant 0 : i32
    %c0_i32_0 = arith.constant 0 : i32
    %c0_i32_1 = arith.constant 0 : i32
    return %c0_i32, %c0_i32_0 : i32, i32
  }
  func.func @transform_5(%arg0: i32) -> (i32, i32) {
    %c0_i32 = arith.constant 0 : i32
    %c0_i32_0 = arith.constant 0 : i32
    return %arg0, %c0_i32 : i32, i32
  }
}

</mosaic_0001>

<bundles_post_ra>
// kernel: tpu_custom_call.1
= control target key start
LH: loop header
LB: loop body
LE: loop exit
PB: predicated region body
PF: predicated region fallthrough
CT: control target
= control target key end

     0   :  { %v3832_v3 = vmov 0.0   ;;  %vm3009_vm0 = vmmov 0   ;;  %s3802_s0 = inlined_call_operand.vmem [shape: f32[4,128], index: 0, kind: input, shape index: {}]   ;;  %s3803_s1 = inlined_call_operand.vmem [shape: f32[1,128], index: 1, kind: input, shape index: {}]   ;;  %s3804_s2 = inlined_call_operand.vmem [shape: f32[1,128], index: 2, kind: input, shape index: {}]   ;;  %s3805_s3 = inlined_call_operand.vmem [shape: f32[128,4], index: 3, kind: input, shape index: {}]   ;;  %s3806_s4 = inlined_call_operand.vmem [shape: f32[4,128], index: 4, kind: input, shape index: {}]   ;;  %s3807_s5 = inlined_call_operand.hbm [shape: f32[4,128], index: 5, kind: output, shape index: {}]  }
   0x1   :  { %v37_v0 = vld [vmem:[%s3805_s3 + $0x78] sm:$0xff]  ;;  %v36_v1 = vld [vmem:[%s3805_s3 + $0x70] sm:$0xff]  ;;  %v35_v2 = vld [vmem:[%s3805_s3 + $0x68] sm:$0xff]  ;;  %2499 = vmatprep.subr.mxu0 %v3832_v3  ;;  %2534 = vmatprep.subr.mxu1 %v3832_v3 }
   0x2   :  { %v3051_v4 = vand.u32 4294901760, %v37_v0  ;;  %v3053_v5 = vand.u32 4294901760, %v36_v1  ;;  %v3055_v6 = vand.u32 4294901760, %v35_v2  ;;  %v34_v7 = vld [vmem:[%s3805_s3 + $0x60] sm:$0xff]  ;;  %v33_v8 = vld [vmem:[%s3805_s3 + $0x58] sm:$0xff]  ;;  %v32_v9 = vld [vmem:[%s3805_s3 + $0x50] sm:$0xff]  ;;  %2531 = vmatprep.mubr.msk.f32.mxu0 %vm3009_vm0, %v3832_v3  ;;  %2566 = vmatprep.mubr.msk.f32.mxu1 %vm3009_vm0, %v3832_v3 }
   0x3   :  { %v3067_v10 = vand.u32 4294901760, %v34_v7  ;;  %v3069_v11 = vand.u32 4294901760, %v33_v8  ;;  %v3071_v12 = vand.u32 4294901760, %v32_v9  ;;  %v31_v13 = vld [vmem:[%s3805_s3 + $0x48] sm:$0xff]  ;;  %v30_v14 = vld [vmem:[%s3805_s3 + $0x40] sm:$0xff]  ;;  %v29_v19 = vld [vmem:[%s3805_s3 + $0x38] sm:$0xff] }
   0x4   :  { %2500 = vmatpush3.msra.mxu0 %v3051_v4  ;;  %v3085_v15 = vsub.f32 %v37_v0, %v3051_v4  ;;  %v3088_v16 = vsub.f32 %v36_v1, %v3053_v5  ;;  %v3090_v17 = vand.u32 4294901760, %v31_v13  ;;  %v3093_v18 = vsub.f32 %v35_v2, %v3055_v6  ;;  %v28_v26 = vld [vmem:[%s3805_s3 + $0x30] sm:$0xff] }
   0x5   :  { %2501 = vmatprep.subr.mxu0 %v3832_v3  ;;  %v3100_v20 = vsub.f32 %v34_v7, %v3067_v10  ;;  %v3103_v21 = vsub.f32 %v33_v8, %v3069_v11  ;;  %v3115_v25 = vand.u32 4294901760, %v30_v14  ;;  %v3124_v28 = vand.u32 4294901760, %v29_v19 }
   0x6   :  { %2502 = vmatpush3.msra.mxu0 %v3053_v5  ;;  %v3107_v22 = vand.u32 4294901760, %v3085_v15  ;;  %v3110_v23 = vand.u32 4294901760, %v3088_v16  ;;  %v3113_v24 = vand.u32 4294901760, %v3093_v18  ;;  %v3130_v30 = vsub.f32 %v32_v9, %v3071_v12 }
   0x7   :  { %2503 = vmatprep.subr.mxu0 %v3832_v3  ;;  %v3122_v27 = vand.u32 4294901760, %v3100_v20  ;;  %v3127_v29 = vand.u32 4294901760, %v3103_v21  ;;  %v3140_v34 = vsub.f32 %v31_v13, %v3090_v17 }
   0x8   :  { %3835 = vst [vmem:[#allocation5_spill] sm:$0xff] %v3107_v22  ;;  %3836 = vst [vmem:[#allocation6_spill] sm:$0xff] %v3110_v23  ;;  %2504 = vmatpush3.msra.mxu0 %v3055_v6  ;;  %v134_v31 = vsub.f32 %v3085_v15, %v3107_v22  ;;  %v141_v32 = vsub.f32 %v3088_v16, %v3110_v23  ;;  %v148_v33 = vsub.f32 %v3093_v18, %v3113_v24 }
   0x9   :  { %3837 = vst [vmem:[#allocation7_spill] sm:$0xff] %v3113_v24  ;;  %3838 = vst [vmem:[#allocation8_spill] sm:$0xff] %v3122_v27 }
   0xa   :  { %3839 = vst [vmem:[#allocation9_spill] sm:$0xff] %v3127_v29 }
   0xb   :  { %10 = vsyncpa [#allocation3], 0  ;;  %2505 = vmatprep.subr.mxu0 %v3832_v3  ;;  %v3143_v35 = vand.u32 4294901760, %v28_v26  ;;  %v27_v36 = vld [vmem:[%s3805_s3 + $0x28] sm:$0xff]  ;;  %v3149_v37 = vand.u32 4294901760, %v134_v31  ;;  %v3151_v38 = vand.u32 4294901760, %v141_v32  ;;  %v155_v39 = vsub.f32 %v3100_v20, %v3122_v27 }
   0xc   :  { %2506 = vmatpush3.msra.mxu0 %v3067_v10  ;;  %v3156_v40 = vand.u32 4294901760, %v3130_v30  ;;  %v26_v41 = vld [vmem:[%s3805_s3 + $0x20] sm:$0xff]  ;;  %v162_v42 = vsub.f32 %v3103_v21, %v3127_v29  ;;  %v3165_v43 = vsub.f32 %v30_v14, %v3115_v25  ;;  %v3169_v44 = vand.u32 4294901760, %v148_v33  ;;  %v25_v49 = vld [vmem:[%s3805_s3 + $0x18] sm:$0xff]  ;;  %v24_v54 = vld [vmem:[%s3805_s3 + $0x10] sm:$0xff]  ;;  %s3010_s30 = smov [#allocation2]  }
   0xd   :  { %2507 = vmatprep.subr.mxu0 %v3832_v3  ;;  %2535 = vmatpush3.msra.mxu1 %v3149_v37  ;;  %v3171_v45 = vand.u32 4294901760, %v27_v36  ;;  %v3174_v46 = vand.u32 4294901760, %v3140_v34  ;;  %v3177_v47 = vsub.f32 %v29_v19, %v3124_v28  ;;  %v3181_v48 = vand.u32 4294901760, %v26_v41  ;;  %v3189_v50 = vld [vmem:[%s3802_s0] sm:$0xf]  ;;  %v23_v60 = vld [vmem:[%s3805_s3 + $0x8] sm:$0xff] }
   0xe   :  { %3840 = vst [vmem:[#allocation10_spill] sm:$0xff] %v3156_v40  ;;  %2508 = vmatpush3.msra.mxu0 %v3069_v11  ;;  %2536 = vmatprep.subr.mxu1 %v3832_v3  ;;  %3842 = vst [vmem:[#allocation12_spill] sm:$0xff] %v3189_v50  ;;  %v3193_v51 = vand.u32 4294901760, %v155_v39  ;;  %v169_v52 = vsub.f32 %v3130_v30, %v3156_v40  ;;  %v3198_v53 = vand.u32 4294901760, %v3165_v43  ;;  %v3208_v56 = vand.u32 4294901760, %v162_v42  ;;  %v22_v7 = vld [vmem:[%s3805_s3] sm:$0xff] }
   0xf   :  { %3841 = vst [vmem:[#allocation11_spill] sm:$0xff] %v3174_v46  ;;  %2509 = vmatprep.subr.mxu0 %v3832_v3  ;;  %2537 = vmatpush3.msra.mxu1 %v3151_v38  ;;  %v3204_v55 = vsub.f32 %v28_v26, %v3143_v35  ;;  %v3211_v57 = vand.u32 4294901760, %v3177_v47  ;;  %v176_v58 = vsub.f32 %v3140_v34, %v3174_v46  ;;  %v3217_v59 = vand.u32 4294901760, %v25_v49  ;;  %s2261_s6 = sshll.u32 %s3010_s30, 4  ;;  %s2262_s6 = int_to_ptr.vmem [resolvable:$true] %s2261_s6 }
  0x10   :  { %2510 = vmatpush3.msra.mxu0 %v3071_v12  ;;  %3843 = vst [vmem:[#allocation13_spill] sm:$0xff] %v3193_v51  ;;  %3844 = vst [vmem:[#allocation14_spill] sm:$0xff] %v3198_v53  ;;  %2538 = vmatprep.subr.mxu1 %v3832_v3  ;;  %v3223_v61 = vsub.f32 %v27_v36, %v3171_v45  ;;  %v3226_v62 = vand.u32 4294901760, %v3189_v50  ;;  %v3230_v63 = vand.u32 4294901760, %v24_v54  ;;  %v3234_v0 = vand.u32 4294901760, %v169_v52  ;;  %s2986_s7 = scalar_lea.vmem %s2262_s6, 64  ;;  %p2991_p1 = scmp.lt.s32.totalorder %s2262_s6, %s2262_s6 }
  0x11   :  { %2511 = vmatprep.subr.mxu0 %v3832_v3  ;;  %3845 = vst [vmem:[#allocation15_spill] sm:$0xff] %v3208_v56  ;;  %3846 = vst [vmem:[#allocation16_spill] sm:$0xff] %v3211_v57  ;;  %2539 = vmatpush3.msra.mxu1 %v3169_v44  ;;  %v183_v1 = vsub.f32 %v3165_v43, %v3198_v53  ;;  %v3239_v2 = vand.u32 4294901760, %v3204_v55  ;;  %v3245_v8 = vsub.f32 %v26_v41, %v3181_v48  ;;  %vm685_vm1 = vcmask 1043456   ;;  %p2987_p0 = scmp.ne.s32.totalorder %s2262_s6, %s2986_s7  ;;  %p2992_p2 = scmp.lt.s32.totalorder %s2986_s7, %s2986_s7 }
  0x12   :  { %2512 = vmatpush3.msra.mxu0 %v3090_v17  ;;  %2540 = vmatprep.subr.mxu1 %v3832_v3  ;;  %3847 = vst [vmem:[#allocation17_spill] sm:$0xff] %v3234_v0  ;;  %v190_v9 = vsub.f32 %v3177_v47, %v3211_v57  ;;  %v3251_v13 = vand.u32 4294901760, %v23_v60  ;;  %v3255_v14 = vand.u32 4294901760, %v176_v58  ;;  %v3258_v19 = vand.u32 4294901760, %v3223_v61 }
  0x13   :  { %2513 = vmatprep.subr.mxu0 %v3832_v3  ;;  %2541 = vmatpush3.msra.mxu1 %v3193_v51  ;;  %3848 = vst [vmem:[#allocation18_spill] sm:$0xff] %v3239_v2  ;;  %v3262_v26 = vsub.f32 %v3189_v50, %v3226_v62  ;;  %v3265_v31 = vsub.f32 %v25_v49, %v3217_v59  ;;  %v3269_v32 = vand.u32 4294901760, %v22_v7  ;;  %v3273_v33 = vand.u32 4294901760, %v183_v1  ;;  %p2993_p3 = por %p2992_p2, %p2991_p1 }
  0x14   :  { %2514 = vmatpush3.msra.mxu0 %v3115_v25  ;;  %2542 = vmatprep.subr.mxu1 %v3832_v3  ;;  %3849 = vst [vmem:[#allocation19_spill] sm:$0xff] %v3255_v14  ;;  %3850 = vst [vmem:[#allocation20_spill] sm:$0xff] %v3258_v19  ;;  %v197_v36 = vsub.f32 %v3204_v55, %v3239_v2  ;;  %v3278_v39 = vand.u32 4294901760, %v3245_v8  ;;  %v3281_v41 = vsub.f32 %v24_v54, %v3230_v63  ;;  %vm681_vm2 = vcmask 31744  }
  0x15   :  { %2515 = vmatprep.subr.mxu0 %v3832_v3  ;;  %2543 = vmatpush3.msra.mxu1 %v3208_v56  ;;  %3851 = vst [vmem:[#allocation21_spill] sm:$0xff] %v3273_v33  ;;  %v3285_v42 = vand.u32 4294901760, %v190_v9  ;;  %v204_v49 = vsub.f32 %v3223_v61, %v3258_v19  ;;  %v3293_v58 = vand.u32 4294901760, %v3265_v31  ;;  %v3296_v54 = vsub.f32 %v23_v60, %v3251_v13  ;;  %p2994_p4 = pnand %p2993_p3, %p2987_p0 }
  0x16   :  { %2516 = vmatpush3.msra.mxu0 %v3124_v28  ;;  %2544 = vmatprep.subr.mxu1 %v3832_v3  ;;  %3852 = vst [vmem:[#allocation22_spill] sm:$0xff] %v3278_v39  ;;  %v3302_v1 = vand.u32 4294901760, %v197_v36  ;;  %v211_v9 = vsub.f32 %v3245_v8, %v3278_v39  ;;  %v3307_v52 = vand.u32 4294901760, %v3281_v41  ;;  %v3310_v50 = vsub.f32 %v22_v7, %v3269_v32 }
  0x17   :  { %2517 = vmatprep.subr.mxu0 %v3832_v3  ;;  %2545 = vmatpush3.msra.mxu1 %v3234_v0  ;;  %3853 = vst [vmem:[#allocation23_spill] sm:$0xff] %v3285_v42  ;;  %3854 = vst [vmem:[#allocation24_spill] sm:$0xff] %v3293_v58  ;;  %v3316_v60 = vand.u32 4294901760, %v204_v49  ;;  %v3857_v36 = vand.u32 4294901760, %v3262_v26  ;;  %v3324_v7 = vand.u32 4294901760, %v3296_v54 }
  0x18   :  { %2518 = vmatpush3.msra.mxu0 %v3143_v35  ;;  %2546 = vmatprep.subr.mxu1 %v3832_v3  ;;  %3855 = vst [vmem:[#allocation25_spill] sm:$0xff] %v3302_v1  ;;  %3856 = vst [vmem:[#allocation26_spill] sm:$0xff] %v3307_v52  ;;  %v3330_v49 = vand.u32 4294901760, %v211_v9 }
  0x19   :  { %2519 = vmatprep.subr.mxu0 %v3832_v3  ;;  %2547 = vmatpush3.msra.mxu1 %v3255_v14  ;;  %v218_v14 = vsub.f32 %v3265_v31, %v3293_v58  ;;  %3858 = vst [vmem:[#allocation27_spill] sm:$0xff] %v3324_v7  ;;  %v232_v9 = vsub.f32 %v3296_v54, %v3324_v7 }
  0x1a   :  { %2520 = vmatpush3.msra.mxu0 %v3171_v45  ;;  %2548 = vmatprep.subr.mxu1 %v3832_v3 }
  0x1b   :  { %2521 = vmatprep.subr.mxu0 %v3832_v3  ;;  %2549 = vmatpush3.msra.mxu1 %v3273_v33  ;;  %v123_v33 = vsub.f32 %v3262_v26, %v3857_v36  ;;  %v3335_v36 = vand.u32 4294901760, %v3310_v50  ;;  %v3341_v56 = vand.u32 4294901760, %v218_v14  ;;  %v3356_v14 = vand.u32 4294901760, %v232_v9 }
  0x1c   :  { %2522 = vmatpush3.msra.mxu0 %v3181_v48  ;;  %2550 = vmatprep.subr.mxu1 %v3832_v3 }
  0x1d   :  { %2523 = vmatprep.subr.mxu0 %v3832_v3  ;;  %2551 = vmatpush3.msra.mxu1 %v3285_v42  ;;  %v225_v42 = vsub.f32 %v3281_v41, %v3307_v52  ;;  %3859 = vst [vmem:[#allocation28_spill] sm:$0xff] %v3335_v36  ;;  %v124_v0 = vand.u32 4294901760, %v123_v33  ;;  %v239_v51 = vsub.f32 %v3310_v50, %v3335_v36 }
  0x1e   :  { %2524 = vmatpush3.msra.mxu0 %v3217_v59  ;;  %2552 = vmatprep.subr.mxu1 %v3832_v3 }
  0x1f   :  { %2525 = vmatprep.subr.mxu0 %v3832_v3  ;;  %2553 = vmatpush3.msra.mxu1 %v3302_v1  ;;  %v3349_v1 = vand.u32 4294901760, %v225_v42  ;;  %v3362_v33 = vand.u32 4294901760, %v239_v51  ;;  %v3860_v51 = vand.u32 4294901760, %v3262_v26 }
  0x20   :  { %2526 = vmatpush3.msra.mxu0 %v3230_v63  ;;  %2554 = vmatprep.subr.mxu1 %v3832_v3 }
  0x21   :  { %2527 = vmatprep.subr.mxu0 %v3832_v3  ;;  %2555 = vmatpush3.msra.mxu1 %v3316_v60 }
  0x22   :  { %2528 = vmatpush3.msra.mxu0 %v3251_v13  ;;  %2556 = vmatprep.subr.mxu1 %v3832_v3 }
  0x23   :  { %2529 = vmatprep.subr.mxu0 %v3832_v3  ;;  %2557 = vmatpush3.msra.mxu1 %v3330_v49 }
  0x24   :  { %2530 = vmatpush3.msra.mxu0 %v3269_v32  ;;  %2558 = vmatprep.subr.mxu1 %v3832_v3 }
  0x25   :  { %2569 = vmatprep.subr.mxu0 %v3832_v3  ;;  %2532 = vmatmul.mubr.f32.vlgmr.msra.gmra.mxu0 %v124_v0  ;;  %v38_v0 = vld [vmem:[%s3806_s4] sm:$0xf] }
  0x26   :  { %2559 = vmatpush3.msra.mxu1 %v3341_v56  ;;  %2570 = vmatpush3.msra.mxu0 %v3085_v15 }
  0x27   :  { %2560 = vmatprep.subr.mxu1 %v3832_v3  ;;  %2571 = vmatprep.subr.mxu0 %v3832_v3 }
  0x28   :  { %2561 = vmatpush3.msra.mxu1 %v3349_v1  ;;  %2572 = vmatpush3.msra.mxu0 %v3088_v16 }
  0x29   :  { %2562 = vmatprep.subr.mxu1 %v3832_v3  ;;  %2573 = vmatprep.subr.mxu0 %v3832_v3 }
  0x2a   :  { %2563 = vmatpush3.msra.mxu1 %v3356_v14  ;;  %2574 = vmatpush3.msra.mxu0 %v3093_v18 }
  0x2b   :  { %2564 = vmatprep.subr.mxu1 %v3832_v3  ;;  %2575 = vmatprep.subr.mxu0 %v3832_v3 }
  0x2c   :  { %2565 = vmatpush3.msra.mxu1 %v3362_v33  ;;  %2576 = vmatpush3.msra.mxu0 %v3100_v20 }
  0x2d   :  { %2567 = vmatmul.mubr.f32.vlgmr.msra.gmra.mxu1 %v3226_v62  ;;  %2577 = vmatprep.subr.mxu0 %v3832_v3 }
  0x2e   :  { %2604 = vmatprep.subr.mxu1 %v3832_v3  ;;  %2578 = vmatpush3.msra.mxu0 %v3103_v21 }
  0x2f   :  { %2605 = vmatpush3.msra.mxu1 %v3051_v4  ;;  %2579 = vmatprep.subr.mxu0 %v3832_v3 }
  0x30   :  { %2606 = vmatprep.subr.mxu1 %v3832_v3  ;;  %2580 = vmatpush3.msra.mxu0 %v3130_v30 }
  0x31   :  { %2607 = vmatpush3.msra.mxu1 %v3053_v5  ;;  %2581 = vmatprep.subr.mxu0 %v3832_v3 }
  0x32   :  { %2608 = vmatprep.subr.mxu1 %v3832_v3  ;;  %2582 = vmatpush3.msra.mxu0 %v3140_v34 }
  0x33   :  { %2609 = vmatpush3.msra.mxu1 %v3055_v6  ;;  %2583 = vmatprep.subr.mxu0 %v3832_v3 }
  0x34   :  { %2610 = vmatprep.subr.mxu1 %v3832_v3  ;;  %2584 = vmatpush3.msra.mxu0 %v3165_v43 }
  0x35   :  { %2611 = vmatpush3.msra.mxu1 %v3067_v10  ;;  %2585 = vmatprep.subr.mxu0 %v3832_v3 }
  0x36   :  { %2612 = vmatprep.subr.mxu1 %v3832_v3  ;;  %2586 = vmatpush3.msra.mxu0 %v3177_v47 }
  0x37   :  { %2613 = vmatpush3.msra.mxu1 %v3069_v11  ;;  %2587 = vmatprep.subr.mxu0 %v3832_v3 }
  0x38   :  { %2614 = vmatprep.subr.mxu1 %v3832_v3  ;;  %2588 = vmatpush3.msra.mxu0 %v3204_v55 }
  0x39   :  { %2615 = vmatpush3.msra.mxu1 %v3071_v12  ;;  %2589 = vmatprep.subr.mxu0 %v3832_v3 }
  0x3a   :  { %2616 = vmatprep.subr.mxu1 %v3832_v3  ;;  %2590 = vmatpush3.msra.mxu0 %v3223_v61 }
  0x3b   :  { %2617 = vmatpush3.msra.mxu1 %v3090_v17  ;;  %2591 = vmatprep.subr.mxu0 %v3832_v3 }
  0x3c   :  { %2618 = vmatprep.subr.mxu1 %v3832_v3  ;;  %2592 = vmatpush3.msra.mxu0 %v3245_v8 }
  0x3d   :  { %2619 = vmatpush3.msra.mxu1 %v3115_v25  ;;  %2593 = vmatprep.subr.mxu0 %v3832_v3 }
  0x3e   :  { %2620 = vmatprep.subr.mxu1 %v3832_v3  ;;  %2594 = vmatpush3.msra.mxu0 %v3265_v31 }
  0x3f   :  { %2621 = vmatpush3.msra.mxu1 %v3124_v28  ;;  %2595 = vmatprep.subr.mxu0 %v3832_v3 }
  0x40   :  { %2622 = vmatprep.subr.mxu1 %v3832_v3  ;;  %2596 = vmatpush3.msra.mxu0 %v3281_v41 }
  0x41   :  { %2623 = vmatpush3.msra.mxu1 %v3143_v35  ;;  %2597 = vmatprep.subr.mxu0 %v3832_v3 }
  0x42   :  { %2624 = vmatprep.subr.mxu1 %v3832_v3  ;;  %2598 = vmatpush3.msra.mxu0 %v3296_v54 }
  0x43   :  { %2625 = vmatpush3.msra.mxu1 %v3171_v45  ;;  %2599 = vmatprep.subr.mxu0 %v3832_v3 }
  0x44   :  { %2626 = vmatprep.subr.mxu1 %v3832_v3  ;;  %2600 = vmatpush3.msra.mxu0 %v3310_v50 }
  0x45   :  { %2601 = vmatprep.mubr.msk.f32.mxu0 %vm3009_vm0, %v3832_v3  ;;  %2627 = vmatpush3.msra.mxu1 %v3181_v48 }
  0x46   :  { %2602 = vmatmul.mubr.f32.vlgmr.msra.gmra.mxu0 %v3262_v26  ;;  %2628 = vmatprep.subr.mxu1 %v3832_v3  ;;  %v687_v26 = vsel %vm685_vm1, %v38_v0, 0 }
  0x47   :  { %2639 = vmatprep.subr.mxu0 %v3832_v3  ;;  %2629 = vmatpush3.msra.mxu1 %v3217_v59  ;;  %v3516_v42 = vand.u32 4294901760, %v687_v26 }
  0x48   :  { %2640 = vmatpush3.msra.mxu0 %v3107_v22  ;;  %2630 = vmatprep.subr.mxu1 %v3832_v3 }
  0x49   :  { %2641 = vmatprep.subr.mxu0 %v3832_v3  ;;  %2631 = vmatpush3.msra.mxu1 %v3230_v63  ;;  %v3519_v9 = vsub.f32 %v687_v26, %v3516_v42 }
  0x4a   :  { %2642 = vmatpush3.msra.mxu0 %v3110_v23  ;;  %2632 = vmatprep.subr.mxu1 %v3832_v3 }
  0x4b   :  { %2643 = vmatprep.subr.mxu0 %v3832_v3  ;;  %2633 = vmatpush3.msra.mxu1 %v3251_v13 }
  0x4c   :  { %2644 = vmatpush3.msra.mxu0 %v3113_v24  ;;  %2634 = vmatprep.subr.mxu1 %v3832_v3 }
  0x4d   :  { %2645 = vmatprep.subr.mxu0 %v3832_v3  ;;  %2635 = vmatpush3.msra.mxu1 %v3269_v32 }
  0x4e   :  { %2636 = vmatprep.mubr.msk.f32.mxu1 %vm3009_vm0, %v3832_v3  ;;  %2646 = vmatpush3.msra.mxu0 %v3122_v27 }
  0x4f   :  { %2637 = vmatmul.mubr.f32.vlgmr.msra.gmra.mxu1 %v3860_v51  ;;  %2647 = vmatprep.subr.mxu0 %v3832_v3 }
  0x50   :  { %2674 = vmatprep.subr.mxu1 %v3832_v3  ;;  %2648 = vmatpush3.msra.mxu0 %v3127_v29 }
  0x51   :  { %2675 = vmatpush3.msra.mxu1 %v3051_v4  ;;  %2649 = vmatprep.subr.mxu0 %v3832_v3 }
  0x52   :  { %2676 = vmatprep.subr.mxu1 %v3832_v3  ;;  %2650 = vmatpush3.msra.mxu0 %v3156_v40 }
  0x53   :  { %2677 = vmatpush3.msra.mxu1 %v3053_v5  ;;  %2651 = vmatprep.subr.mxu0 %v3832_v3 }
  0x54   :  { %2678 = vmatprep.subr.mxu1 %v3832_v3  ;;  %2652 = vmatpush3.msra.mxu0 %v3174_v46 }
  0x55   :  { %2679 = vmatpush3.msra.mxu1 %v3055_v6  ;;  %2653 = vmatprep.subr.mxu0 %v3832_v3 }
  0x56   :  { %2680 = vmatprep.subr.mxu1 %v3832_v3  ;;  %2654 = vmatpush3.msra.mxu0 %v3198_v53 }
  0x57   :  { %2681 = vmatpush3.msra.mxu1 %v3067_v10  ;;  %2655 = vmatprep.subr.mxu0 %v3832_v3 }
  0x58   :  { %2682 = vmatprep.subr.mxu1 %v3832_v3  ;;  %2656 = vmatpush3.msra.mxu0 %v3211_v57 }
  0x59   :  { %2683 = vmatpush3.msra.mxu1 %v3069_v11  ;;  %2657 = vmatprep.subr.mxu0 %v3832_v3 }
  0x5a   :  { %2684 = vmatprep.subr.mxu1 %v3832_v3  ;;  %2658 = vmatpush3.msra.mxu0 %v3239_v2 }
  0x5b   :  { %2685 = vmatpush3.msra.mxu1 %v3071_v12  ;;  %2659 = vmatprep.subr.mxu0 %v3832_v3 }
  0x5c   :  { %2686 = vmatprep.subr.mxu1 %v3832_v3  ;;  %2660 = vmatpush3.msra.mxu0 %v3258_v19 }
  0x5d   :  { %2687 = vmatpush3.msra.mxu1 %v3090_v17  ;;  %2661 = vmatprep.subr.mxu0 %v3832_v3 }
  0x5e   :  { %2688 = vmatprep.subr.mxu1 %v3832_v3  ;;  %2662 = vmatpush3.msra.mxu0 %v3278_v39 }
  0x5f   :  { %2689 = vmatpush3.msra.mxu1 %v3115_v25  ;;  %2663 = vmatprep.subr.mxu0 %v3832_v3 }
  0x60   :  { %2690 = vmatprep.subr.mxu1 %v3832_v3  ;;  %2664 = vmatpush3.msra.mxu0 %v3293_v58 }
  0x61   :  { %2691 = vmatpush3.msra.mxu1 %v3124_v28  ;;  %2665 = vmatprep.subr.mxu0 %v3832_v3 }
  0x62   :  { %2692 = vmatprep.subr.mxu1 %v3832_v3  ;;  %2666 = vmatpush3.msra.mxu0 %v3307_v52 }
  0x63   :  { %2693 = vmatpush3.msra.mxu1 %v3143_v35  ;;  %2667 = vmatprep.subr.mxu0 %v3832_v3 }
  0x64   :  { %2694 = vmatprep.subr.mxu1 %v3832_v3  ;;  %2668 = vmatpush3.msra.mxu0 %v3324_v7 }
  0x65   :  { %2695 = vmatpush3.msra.mxu1 %v3171_v45  ;;  %2669 = vmatprep.subr.mxu0 %v3832_v3 }
  0x66   :  { %2696 = vmatprep.subr.mxu1 %v3832_v3  ;;  %2670 = vmatpush3.msra.mxu0 %v3335_v36 }
  0x67   :  { %2671 = vmatprep.mubr.msk.f32.mxu0 %vm3009_vm0, %v3832_v3  ;;  %2697 = vmatpush3.msra.mxu1 %v3181_v48 }
  0x68   :  { %2672 = vmatmul.mubr.f32.vlgmr.msra.gmra.mxu0 %v3226_v62  ;;  %2698 = vmatprep.subr.mxu1 %v3832_v3 }
  0x69   :  { %2706 = vmatprep.mubr.msk.f32.mxu1 %vm3009_vm0, %v3832_v3  ;;  %2699 = vmatpush3.msra.mxu1 %v3217_v59 }
  0x6a   :  { %2709 = vmatprep.subr.mxu0 %v3832_v3  ;;  %2700 = vmatprep.subr.mxu1 %v3832_v3 }
  0x6b   :  { %2711 = vmatprep.mubr.msk.f32.mxu0 %vm3009_vm0, %v3832_v3  ;;  %2701 = vmatpush3.msra.mxu1 %v3230_v63 }
  0x6c   :  { %2702 = vmatprep.subr.mxu1 %v3832_v3  ;;  %2710 = vmatpush3.msra.mxu0 %v3516_v42 }
  0x6d   :  { %2703 = vmatpush3.msra.mxu1 %v3251_v13  ;;  %2719 = vmatprep.subr.mxu0 %v3832_v3 }
  0x6e   :  { %2704 = vmatprep.subr.mxu1 %v3832_v3 }
  0x6f   :  { %2705 = vmatpush3.msra.mxu1 %v3269_v32 }
  0x70   :  { %2707 = vmatmul.mubr.f32.vlgmr.msra.gmra.mxu1 %v3226_v62  ;;  %2714 = vmatprep.subr.mxu1 %v3832_v3  ;;  %v3524_v62 = vand.u32 4294901760, %v3519_v9 }
  0x71   :  { %2716 = vmatprep.mubr.msk.f32.mxu1 %vm3009_vm0, %v3832_v3 }
  0x72   :  { %v799_v51 = vsub.f32 %v3519_v9, %v3524_v62 }
  0x74   :  { %v3528_v36 = vand.u32 4294901760, %v799_v51 }
  0x76   :  { %3861 = vst [vmem:[#allocation29_spill] sm:$0xff] %v3528_v36  ;;  %2715 = vmatpush3.msra.mxu1 %v3528_v36 }
  0x77   :  { %2724 = vmatprep.subr.mxu1 %v3832_v3 }
  0xe5   :  { %v126_v0 = vpop.f32.mrf.mxu0 }
  0xe7   :  { %v2533_v7 = vpop.f32.mrf.mxu0 }
  0xed   :  { %v277_v26 = vpop.f32.mrf.mxu1 }
  0xee   :  { %v278_v53 = vadd.f32 %v277_v26, %v126_v0 }
  0xef   :  { %v2568_v52 = vpop.f32.mrf.mxu1 }
 0x106   :  { %v381_v58 = vpop.f32.mrf.mxu0 }
 0x107   :  { %v382_v40 = vadd.f32 %v381_v58, %v278_v53 }
 0x108   :  { %v2603_v39 = vpop.f32.mrf.mxu0 }
 0x109   :  { %v3862_v39 = vmov 0.0  }
 0x10f   :  { %v470_v19 = vpop.f32.mrf.mxu1 }
 0x110   :  { %v471_v29 = vadd.f32 %v470_v19, %v382_v40  ;;  %v3869_v40 = vld [vmem:[#allocation25_spill] sm:$0xff] }
 0x111   :  { %v2638_v2 = vpop.f32.mrf.mxu1 }
 0x128   :  { %v589_v57 = vpop.f32.mrf.mxu0 }
 0x129   :  { %v590_v27 = vadd.f32 %v589_v57, %v471_v29 }
 0x12a   :  { %v2673_v46 = vpop.f32.mrf.mxu0 }
 0x130   :  { %v676_v51 = vpop.f32.mrf.mxu1 }
 0x131   :  { %v677_v24 = vadd.f32 %v676_v51, %v590_v27  ;;  %v3866_v27 = vld [vmem:[#allocation19_spill] sm:$0xff] }
 0x132   :  { %v2708_v36 = vpop.f32.mrf.mxu1 }
 0x133   :  { %v680_v23 = vmul.f32 0.03125, %v677_v24 }
 0x135   :  { %v683_v3 = vsel %vm681_vm2, %v680_v23, 0  ;;  %v3865_v23 = vld [vmem:[#allocation17_spill] sm:$0xff] }
 0x136   :  { %v755_v7 = vand.u32 4294901760, %v683_v3 }
 0x138   :  { %v756_v22 = vsub.f32 %v683_v3, %v755_v7  ;;  %2717 = vmatmul.mubr.f32.vlgmr.msra.gmra.mxu1 %v755_v7  ;;  %v3863_v3 = vld [vmem:[#allocation13_spill] sm:$0xff] }
 0x139   :  { %2725 = vmatpush3.msra.mxu1 %v3516_v42  ;;  %2726 = vmatprep.mubr.msk.f32.mxu1 %vm3009_vm0, %v3862_v39 }
 0x13a   :  { %v757_v2 = vand.u32 4294901760, %v756_v22  ;;  %2734 = vmatprep.subr.mxu1 %v3862_v39 }
 0x13c   :  { %2727 = vmatmul.mubr.f32.vlgmr.msra.gmra.mxu1 %v757_v2  ;;  %v758_v29 = vsub.f32 %v756_v22, %v757_v2 }
 0x13d   :  { %2735 = vmatpush3.msra.mxu1 %v3516_v42  ;;  %2736 = vmatprep.mubr.msk.f32.mxu1 %vm3009_vm0, %v3862_v39 }
 0x13e   :  { %v759_v24 = vand.u32 4294901760, %v758_v29  ;;  %2774 = vmatprep.subr.mxu1 %v3862_v39 }
 0x140   :  { %2712 = vmatmul.mubr.f32.vlgmr.msra.gmra.mxu0 %v759_v24  ;;  %2737 = vmatmul.mubr.f32.vlgmr.msra.gmra.mxu1 %v755_v7 }
 0x141   :  { %2720 = vmatpush3.msra.mxu0 %v3519_v9  ;;  %2721 = vmatprep.mubr.msk.f32.mxu0 %vm3009_vm0, %v3862_v39 }
 0x142   :  { %2729 = vmatprep.subr.mxu0 %v3862_v39  ;;  %2775 = vmatpush3.msra.mxu1 %v3149_v37  ;;  %v3867_v37 = vld [vmem:[#allocation21_spill] sm:$0xff] }
 0x143   :  { %2776 = vmatprep.subr.mxu1 %v3862_v39  ;;  %2806 = vmatprep.mubr.msk.f32.mxu1 %vm3009_vm0, %v3862_v39 }
 0x144   :  { %2722 = vmatmul.mubr.f32.vlgmr.msra.gmra.mxu0 %v756_v22  ;;  %2777 = vmatpush3.msra.mxu1 %v3151_v38  ;;  %v3864_v22 = vld [vmem:[#allocation15_spill] sm:$0xff] }
 0x145   :  { %2730 = vmatpush3.msra.mxu0 %v3524_v62  ;;  %2731 = vmatprep.mubr.msk.f32.mxu0 %vm3009_vm0, %v3862_v39  ;;  %v3868_v38 = vld [vmem:[#allocation23_spill] sm:$0xff] }
 0x146   :  { %2778 = vmatprep.subr.mxu1 %v3862_v39  ;;  %2739 = vmatprep.subr.mxu0 %v3862_v39 }
 0x147   :  { %2779 = vmatpush3.msra.mxu1 %v3169_v44 }
 0x148   :  { %2732 = vmatmul.mubr.f32.vlgmr.msra.gmra.mxu0 %v755_v7  ;;  %2780 = vmatprep.subr.mxu1 %v3862_v39  ;;  %v3870_v7 = vld [vmem:[#allocation12_spill] sm:$0xff] }
 0x149   :  { %2781 = vmatpush3.msra.mxu1 %v3863_v3  ;;  %2740 = vmatpush3.msra.mxu0 %v3051_v4 }
 0x14a   :  { %2782 = vmatprep.subr.mxu1 %v3862_v39  ;;  %2741 = vmatprep.subr.mxu0 %v3862_v39 }
 0x14b   :  { %2783 = vmatpush3.msra.mxu1 %v3864_v22  ;;  %2742 = vmatpush3.msra.mxu0 %v3053_v5 }
 0x14c   :  { %2784 = vmatprep.subr.mxu1 %v3862_v39  ;;  %2743 = vmatprep.subr.mxu0 %v3862_v39 }
 0x14d   :  { %2785 = vmatpush3.msra.mxu1 %v3865_v23  ;;  %2744 = vmatpush3.msra.mxu0 %v3055_v6 }
 0x14e   :  { %2786 = vmatprep.subr.mxu1 %v3862_v39  ;;  %2745 = vmatprep.subr.mxu0 %v3862_v39 }
 0x14f   :  { %2787 = vmatpush3.msra.mxu1 %v3866_v27  ;;  %2746 = vmatpush3.msra.mxu0 %v3067_v10 }
 0x150   :  { %2788 = vmatprep.subr.mxu1 %v3862_v39  ;;  %2747 = vmatprep.subr.mxu0 %v3862_v39 }
 0x151   :  { %2789 = vmatpush3.msra.mxu1 %v3867_v37  ;;  %2748 = vmatpush3.msra.mxu0 %v3069_v11 }
 0x152   :  { %2790 = vmatprep.subr.mxu1 %v3862_v39  ;;  %2749 = vmatprep.subr.mxu0 %v3862_v39 }
 0x153   :  { %2791 = vmatpush3.msra.mxu1 %v3868_v38  ;;  %2750 = vmatpush3.msra.mxu0 %v3071_v12 }
 0x154   :  { %2792 = vmatprep.subr.mxu1 %v3862_v39  ;;  %2751 = vmatprep.subr.mxu0 %v3862_v39 }
 0x155   :  { %2793 = vmatpush3.msra.mxu1 %v3869_v40  ;;  %2752 = vmatpush3.msra.mxu0 %v3090_v17 }
 0x156   :  { %2794 = vmatprep.subr.mxu1 %v3862_v39  ;;  %2753 = vmatprep.subr.mxu0 %v3862_v39 }
 0x157   :  { %2795 = vmatpush3.msra.mxu1 %v3316_v60  ;;  %2754 = vmatpush3.msra.mxu0 %v3115_v25 }
 0x158   :  { %2796 = vmatprep.subr.mxu1 %v3862_v39  ;;  %2755 = vmatprep.subr.mxu0 %v3862_v39 }
 0x159   :  { %2797 = vmatpush3.msra.mxu1 %v3330_v49  ;;  %2756 = vmatpush3.msra.mxu0 %v3124_v28 }
 0x15a   :  { %2798 = vmatprep.subr.mxu1 %v3862_v39  ;;  %2757 = vmatprep.subr.mxu0 %v3862_v39 }
 0x15b   :  { %2799 = vmatpush3.msra.mxu1 %v3341_v56  ;;  %2758 = vmatpush3.msra.mxu0 %v3143_v35 }
 0x15c   :  { %2800 = vmatprep.subr.mxu1 %v3862_v39  ;;  %2759 = vmatprep.subr.mxu0 %v3862_v39 }
 0x15d   :  { %2801 = vmatpush3.msra.mxu1 %v3349_v1  ;;  %2760 = vmatpush3.msra.mxu0 %v3171_v45 }
 0x15e   :  { %2802 = vmatprep.subr.mxu1 %v3862_v39  ;;  %2761 = vmatprep.subr.mxu0 %v3862_v39 }
 0x15f   :  { %2803 = vmatpush3.msra.mxu1 %v3356_v14  ;;  %2762 = vmatpush3.msra.mxu0 %v3181_v48 }
 0x160   :  { %2804 = vmatprep.subr.mxu1 %v3862_v39  ;;  %2763 = vmatprep.subr.mxu0 %v3862_v39 }
 0x161   :  { %2805 = vmatpush3.msra.mxu1 %v3362_v33  ;;  %2764 = vmatpush3.msra.mxu0 %v3217_v59 }
 0x162   :  { %2844 = vmatprep.subr.mxu1 %v3862_v39  ;;  %2765 = vmatprep.subr.mxu0 %v3862_v39 }
 0x163   :  { %2766 = vmatpush3.msra.mxu0 %v3230_v63  ;;  %2771 = vmatprep.mubr.msk.f32.mxu0 %vm3009_vm0, %v3862_v39 }
 0x164   :  { %2767 = vmatprep.subr.mxu0 %v3862_v39 }
 0x165   :  { %2768 = vmatpush3.msra.mxu0 %v3251_v13 }
 0x166   :  { %2769 = vmatprep.subr.mxu0 %v3862_v39 }
 0x167   :  { %2770 = vmatpush3.msra.mxu0 %v3269_v32 }
 0x168   :  { %2809 = vmatprep.subr.mxu0 %v3862_v39 }
 0x1f8   :  { %v837_v44 = vpop.f32.mrf.mxu1 }
 0x1fa   :  { %v2718_v46 = vpop.f32.mrf.mxu1 }
 0x1fc   :  { %v985_v53 = vpop.f32.mrf.mxu1 }
 0x1fe   :  { %v2728_v56 = vpop.f32.mrf.mxu1 }
 0x200   :  { %v761_v57 = vpop.f32.mrf.mxu0  ;;  %v1131_v19 = vpop.f32.mrf.mxu1 }
 0x201   :  { %v838_v1 = vadd.f32 %v837_v44, %v761_v57 }
 0x202   :  { %v2713_v52 = vpop.f32.mrf.mxu0  ;;  %v2738_v58 = vpop.f32.mrf.mxu1 }
 0x204   :  { %v911_v60 = vpop.f32.mrf.mxu0 }
 0x205   :  { %v912_v49 = vadd.f32 %v911_v60, %v838_v1 }
 0x206   :  { %v2723_v36 = vpop.f32.mrf.mxu0 }
 0x207   :  { %v986_v14 = vadd.f32 %v985_v53, %v912_v49 }
 0x208   :  { %v1059_v33 = vpop.f32.mrf.mxu0 }
 0x209   :  { %v1060_v0 = vadd.f32 %v1059_v33, %v986_v14 }
 0x20a   :  { %v2733_v26 = vpop.f32.mrf.mxu0 }
 0x20b   :  { %v1132_v51 = vadd.f32 %v1131_v19, %v1060_v0 }
 0x20d   :  { %v3618_v2 = vsub.f32 %v3870_v7, %v1132_v51 }
 0x20f   :  { %v1136_v29 = vmul.f32 %v3618_v2, %v3618_v2 }
 0x211   :  { %v3622_v24 = vand.u32 4294901760, %v1136_v29 }
 0x213   :  { %2807 = vmatmul.mubr.f32.vlgmr.msra.gmra.mxu1 %v3622_v24  ;;  %v3626_v3 = vsub.f32 %v1136_v29, %v3622_v24 }
 0x214   :  { %2845 = vmatpush3.msra.mxu1 %v3051_v4  ;;  %2876 = vmatprep.mubr.msk.f32.mxu1 %vm3009_vm0, %v3862_v39 }
 0x215   :  { %2846 = vmatprep.subr.mxu1 %v3862_v39  ;;  %v1220_v22 = vand.u32 4294901760, %v3626_v3 }
 0x216   :  { %2847 = vmatpush3.msra.mxu1 %v3053_v5 }
 0x217   :  { %2848 = vmatprep.subr.mxu1 %v3862_v39  ;;  %v1221_v23 = vsub.f32 %v3626_v3, %v1220_v22 }
 0x218   :  { %2849 = vmatpush3.msra.mxu1 %v3055_v6 }
 0x219   :  { %2850 = vmatprep.subr.mxu1 %v3862_v39  ;;  %v1222_v27 = vand.u32 4294901760, %v1221_v23 }
 0x21a   :  { %2851 = vmatpush3.msra.mxu1 %v3067_v10 }
 0x21b   :  { %2852 = vmatprep.subr.mxu1 %v3862_v39  ;;  %2772 = vmatmul.mubr.f32.vlgmr.msra.gmra.mxu0 %v1222_v27 }
 0x21c   :  { %2810 = vmatpush3.msra.mxu0 %v3085_v15  ;;  %2853 = vmatpush3.msra.mxu1 %v3069_v11  ;;  %v3877_v15 = vld [vmem:[#allocation11_spill] sm:$0xff] }
 0x21d   :  { %2811 = vmatprep.subr.mxu0 %v3862_v39  ;;  %2854 = vmatprep.subr.mxu1 %v3862_v39 }
 0x21e   :  { %2812 = vmatpush3.msra.mxu0 %v3088_v16  ;;  %2855 = vmatpush3.msra.mxu1 %v3071_v12  ;;  %v3878_v16 = vld [vmem:[#allocation14_spill] sm:$0xff] }
 0x21f   :  { %2813 = vmatprep.subr.mxu0 %v3862_v39  ;;  %2856 = vmatprep.subr.mxu1 %v3862_v39 }
 0x220   :  { %2814 = vmatpush3.msra.mxu0 %v3093_v18  ;;  %2857 = vmatpush3.msra.mxu1 %v3090_v17  ;;  %v3880_v18 = vld [vmem:[#allocation18_spill] sm:$0xff] }
 0x221   :  { %2815 = vmatprep.subr.mxu0 %v3862_v39  ;;  %2858 = vmatprep.subr.mxu1 %v3862_v39 }
 0x222   :  { %2816 = vmatpush3.msra.mxu0 %v3100_v20  ;;  %2859 = vmatpush3.msra.mxu1 %v3115_v25  ;;  %v3881_v20 = vld [vmem:[#allocation20_spill] sm:$0xff] }
 0x223   :  { %2817 = vmatprep.subr.mxu0 %v3862_v39  ;;  %2860 = vmatprep.subr.mxu1 %v3862_v39 }
 0x224   :  { %2818 = vmatpush3.msra.mxu0 %v3103_v21  ;;  %2861 = vmatpush3.msra.mxu1 %v3124_v28  ;;  %v3882_v21 = vld [vmem:[#allocation22_spill] sm:$0xff] }
 0x225   :  { %2819 = vmatprep.subr.mxu0 %v3862_v39  ;;  %2862 = vmatprep.subr.mxu1 %v3862_v39 }
 0x226   :  { %2820 = vmatpush3.msra.mxu0 %v3130_v30  ;;  %2863 = vmatpush3.msra.mxu1 %v3143_v35  ;;  %v3885_v30 = vld [vmem:[#allocation29_spill] sm:$0xff] }
 0x227   :  { %2821 = vmatprep.subr.mxu0 %v3862_v39  ;;  %2864 = vmatprep.subr.mxu1 %v3862_v39 }
 0x228   :  { %2822 = vmatpush3.msra.mxu0 %v3140_v34  ;;  %2865 = vmatpush3.msra.mxu1 %v3171_v45  ;;  %v3886_v34 = vld [vmem:[#allocation27_spill] sm:$0xff] }
 0x229   :  { %2823 = vmatprep.subr.mxu0 %v3862_v39  ;;  %2866 = vmatprep.subr.mxu1 %v3862_v39 }
 0x22a   :  { %2824 = vmatpush3.msra.mxu0 %v3165_v43  ;;  %2867 = vmatpush3.msra.mxu1 %v3181_v48 }
 0x22b   :  { %2825 = vmatprep.subr.mxu0 %v3862_v39  ;;  %2868 = vmatprep.subr.mxu1 %v3862_v39 }
 0x22c   :  { %2826 = vmatpush3.msra.mxu0 %v3177_v47  ;;  %2869 = vmatpush3.msra.mxu1 %v3217_v59 }
 0x22d   :  { %2827 = vmatprep.subr.mxu0 %v3862_v39  ;;  %2870 = vmatprep.subr.mxu1 %v3862_v39 }
 0x22e   :  { %2828 = vmatpush3.msra.mxu0 %v3204_v55  ;;  %2871 = vmatpush3.msra.mxu1 %v3230_v63 }
 0x22f   :  { %2829 = vmatprep.subr.mxu0 %v3862_v39  ;;  %2872 = vmatprep.subr.mxu1 %v3862_v39 }
 0x230   :  { %2830 = vmatpush3.msra.mxu0 %v3223_v61  ;;  %2873 = vmatpush3.msra.mxu1 %v3251_v13 }
 0x231   :  { %2831 = vmatprep.subr.mxu0 %v3862_v39  ;;  %2874 = vmatprep.subr.mxu1 %v3862_v39 }
 0x232   :  { %2832 = vmatpush3.msra.mxu0 %v3245_v8  ;;  %2875 = vmatpush3.msra.mxu1 %v3269_v32 }
 0x233   :  { %2833 = vmatprep.subr.mxu0 %v3862_v39  ;;  %2877 = vmatmul.mubr.f32.vlgmr.msra.gmra.mxu1 %v1220_v22 }
 0x234   :  { %2914 = vmatprep.subr.mxu1 %v3862_v39  ;;  %2834 = vmatpush3.msra.mxu0 %v3265_v31 }
 0x235   :  { %2915 = vmatpush3.msra.mxu1 %v3051_v4  ;;  %2835 = vmatprep.subr.mxu0 %v3862_v39  ;;  %v3871_v4 = vld [vmem:[#allocation5_spill] sm:$0xff] }
 0x236   :  { %2916 = vmatprep.subr.mxu1 %v3862_v39  ;;  %2836 = vmatpush3.msra.mxu0 %v3281_v41 }
 0x237   :  { %2917 = vmatpush3.msra.mxu1 %v3053_v5  ;;  %2837 = vmatprep.subr.mxu0 %v3862_v39  ;;  %v3872_v5 = vld [vmem:[#allocation6_spill] sm:$0xff] }
 0x238   :  { %2918 = vmatprep.subr.mxu1 %v3862_v39  ;;  %2838 = vmatpush3.msra.mxu0 %v3296_v54 }
 0x239   :  { %2919 = vmatpush3.msra.mxu1 %v3055_v6  ;;  %2839 = vmatprep.subr.mxu0 %v3862_v39  ;;  %v3873_v6 = vld [vmem:[#allocation7_spill] sm:$0xff] }
 0x23a   :  { %2920 = vmatprep.subr.mxu1 %v3862_v39  ;;  %2840 = vmatpush3.msra.mxu0 %v3310_v50 }
 0x23b   :  { %2841 = vmatprep.mubr.msk.f32.mxu0 %vm3009_vm0, %v3862_v39  ;;  %2921 = vmatpush3.msra.mxu1 %v3067_v10  ;;  %v3874_v10 = vld [vmem:[#allocation8_spill] sm:$0xff] }
 0x23c   :  { %2842 = vmatmul.mubr.f32.vlgmr.msra.gmra.mxu0 %v3626_v3  ;;  %2879 = vmatprep.subr.mxu0 %v3862_v39 }
 0x23d   :  { %2922 = vmatprep.subr.mxu1 %v3862_v39  ;;  %2880 = vmatpush3.msra.mxu0 %v3871_v4 }
 0x23e   :  { %2923 = vmatpush3.msra.mxu1 %v3069_v11  ;;  %2881 = vmatprep.subr.mxu0 %v3862_v39  ;;  %v3875_v11 = vld [vmem:[#allocation9_spill] sm:$0xff] }
 0x23f   :  { %2924 = vmatprep.subr.mxu1 %v3862_v39  ;;  %2882 = vmatpush3.msra.mxu0 %v3872_v5 }
 0x240   :  { %2925 = vmatpush3.msra.mxu1 %v3071_v12  ;;  %2883 = vmatprep.subr.mxu0 %v3862_v39  ;;  %v3876_v12 = vld [vmem:[#allocation10_spill] sm:$0xff] }
 0x241   :  { %2926 = vmatprep.subr.mxu1 %v3862_v39  ;;  %2884 = vmatpush3.msra.mxu0 %v3873_v6 }
 0x242   :  { %2927 = vmatpush3.msra.mxu1 %v3090_v17  ;;  %2885 = vmatprep.subr.mxu0 %v3862_v39  ;;  %v3879_v17 = vld [vmem:[#allocation16_spill] sm:$0xff] }
 0x243   :  { %2928 = vmatprep.subr.mxu1 %v3862_v39  ;;  %2886 = vmatpush3.msra.mxu0 %v3874_v10 }
 0x244   :  { %2929 = vmatpush3.msra.mxu1 %v3115_v25  ;;  %2887 = vmatprep.subr.mxu0 %v3862_v39  ;;  %v3883_v25 = vld [vmem:[#allocation24_spill] sm:$0xff] }
 0x245   :  { %2930 = vmatprep.subr.mxu1 %v3862_v39  ;;  %2888 = vmatpush3.msra.mxu0 %v3875_v11  ;;  %v2270_v11 = vld [vmem:[%s3804_s2] ss:$0 sm:$0xff] }
 0x246   :  { %2931 = vmatpush3.msra.mxu1 %v3124_v28  ;;  %2889 = vmatprep.subr.mxu0 %v3862_v39  ;;  %v3884_v28 = vld [vmem:[#allocation26_spill] sm:$0xff] }
 0x247   :  { %2932 = vmatprep.subr.mxu1 %v3862_v39  ;;  %2890 = vmatpush3.msra.mxu0 %v3876_v12 }
 0x248   :  { %2933 = vmatpush3.msra.mxu1 %v3143_v35  ;;  %2891 = vmatprep.subr.mxu0 %v3862_v39  ;;  %v3887_v35 = vld [vmem:[#allocation28_spill] sm:$0xff] }
 0x249   :  { %2934 = vmatprep.subr.mxu1 %v3862_v39  ;;  %2892 = vmatpush3.msra.mxu0 %v3877_v15 }
 0x24a   :  { %2935 = vmatpush3.msra.mxu1 %v3171_v45  ;;  %2893 = vmatprep.subr.mxu0 %v3862_v39 }
 0x24b   :  { %2936 = vmatprep.subr.mxu1 %v3862_v39  ;;  %2894 = vmatpush3.msra.mxu0 %v3878_v16 }
 0x24c   :  { %2937 = vmatpush3.msra.mxu1 %v3181_v48  ;;  %2895 = vmatprep.subr.mxu0 %v3862_v39 }
 0x24d   :  { %2938 = vmatprep.subr.mxu1 %v3862_v39  ;;  %2896 = vmatpush3.msra.mxu0 %v3879_v17 }
 0x24e   :  { %2939 = vmatpush3.msra.mxu1 %v3217_v59  ;;  %2897 = vmatprep.subr.mxu0 %v3862_v39 }
 0x24f   :  { %2940 = vmatprep.subr.mxu1 %v3862_v39  ;;  %2898 = vmatpush3.msra.mxu0 %v3880_v18 }
 0x250   :  { %2941 = vmatpush3.msra.mxu1 %v3230_v63  ;;  %2899 = vmatprep.subr.mxu0 %v3862_v39 }
 0x251   :  { %2942 = vmatprep.subr.mxu1 %v3862_v39  ;;  %2900 = vmatpush3.msra.mxu0 %v3881_v20 }
 0x252   :  { %2943 = vmatpush3.msra.mxu1 %v3251_v13  ;;  %2901 = vmatprep.subr.mxu0 %v3862_v39 }
 0x253   :  { %2944 = vmatprep.subr.mxu1 %v3862_v39  ;;  %2902 = vmatpush3.msra.mxu0 %v3882_v21 }
 0x254   :  { %2945 = vmatpush3.msra.mxu1 %v3269_v32  ;;  %2946 = vmatprep.mubr.msk.f32.mxu1 %vm3009_vm0, %v3862_v39 }
 0x255   :  { %2903 = vmatprep.subr.mxu0 %v3862_v39  ;;  %2947 = vmatmul.mubr.f32.vlgmr.msra.gmra.mxu1 %v3622_v24 }
 0x256   :  { %2904 = vmatpush3.msra.mxu0 %v3883_v25  ;;  %2911 = vmatprep.mubr.msk.f32.mxu0 %vm3009_vm0, %v3862_v39 }
 0x257   :  { %2905 = vmatprep.subr.mxu0 %v3862_v39  ;;  %2954 = vmatprep.subr.mxu1 %v3862_v39 }
 0x258   :  { %2906 = vmatpush3.msra.mxu0 %v3884_v28  ;;  %2955 = vmatpush3.msra.mxu1 %v3885_v30 }
 0x259   :  { %2907 = vmatprep.subr.mxu0 %v3862_v39  ;;  %2956 = vmatprep.mubr.msk.f32.mxu1 %vm3009_vm0, %v3862_v39 }
 0x25a   :  { %2908 = vmatpush3.msra.mxu0 %v3886_v34  ;;  %2964 = vmatprep.subr.mxu1 %v3862_v39 }
 0x25b   :  { %2909 = vmatprep.subr.mxu0 %v3862_v39 }
 0x25c   :  { %2910 = vmatpush3.msra.mxu0 %v3887_v35 }
 0x25d   :  { %2912 = vmatmul.mubr.f32.vlgmr.msra.gmra.mxu0 %v3622_v24  ;;  %2949 = vmatprep.subr.mxu0 %v3862_v39 }
 0x25e   :  { %2950 = vmatpush3.msra.mxu0 %v3516_v42  ;;  %2951 = vmatprep.mubr.msk.f32.mxu0 %vm3009_vm0, %v3862_v39 }
 0x25f   :  { %2959 = vmatprep.subr.mxu0 %v3862_v39 }
 0x2d3   :  { %v1375_v43 = vpop.f32.mrf.mxu1 }
 0x2d5   :  { %v2808_v45 = vpop.f32.mrf.mxu1 }
 0x2db   :  { %v1224_v47 = vpop.f32.mrf.mxu0 }
 0x2dc   :  { %v1376_v8 = vadd.f32 %v1375_v43, %v1224_v47 }
 0x2dd   :  { %v2773_v48 = vpop.f32.mrf.mxu0 }
 0x2f3   :  { %v1568_v50 = vpop.f32.mrf.mxu1 }
 0x2f5   :  { %v2878_v55 = vpop.f32.mrf.mxu1 }
 0x2fc   :  { %v1479_v59 = vpop.f32.mrf.mxu0 }
 0x2fd   :  { %v1480_v31 = vadd.f32 %v1479_v59, %v1376_v8 }
 0x2fe   :  { %v2843_v61 = vpop.f32.mrf.mxu0 }
 0x2ff   :  { %v1569_v32 = vadd.f32 %v1568_v50, %v1480_v31 }
 0x315   :  { %v1774_v63 = vpop.f32.mrf.mxu1 }
 0x317   :  { %v2948_v13 = vpop.f32.mrf.mxu1 }
 0x31d   :  { %v1687_v41 = vpop.f32.mrf.mxu0 }
 0x31e   :  { %v1688_v54 = vadd.f32 %v1687_v41, %v1569_v32 }
 0x31f   :  { %v2913_v37 = vpop.f32.mrf.mxu0 }
 0x320   :  { %v1775_v38 = vadd.f32 %v1774_v63, %v1688_v54 }
 0x322   :  { %v1778_v40 = vmul.f32 0.032258064, %v1775_v38 }
 0x324   :  { %2982 = vrsqrt.f32 %v1778_v40  ;;  %vm1781_vm3 = vcmp.eq.f32.partialorder %v1778_v40, inf  ;;  %v1784_v53 = vand.u32 2147483648, %v1778_v40  ;;  %vm1783_vm4 = vcmp.eq.f32.partialorder %v1778_v40, 0.0 }
 0x331   :  { %v2983_v44 = vpop.eup %2982 }
 0x332   :  { %v1780_v46 = vmul.f32 %v2983_v44, %v1778_v40 }
 0x334   :  { %v1782_v56 = vsel %vm1781_vm3, %v1778_v40, %v1780_v46 }
 0x335   :  { %v1785_v57 = vsel %vm1783_vm4, %v1784_v53, %v1782_v56 }
 0x336   :  { %v1786_v19 = vadd.f32 1e-06, %v1785_v57 }
 0x338   :  { %2984 = vrcp.f32 %v1786_v19 }
 0x345   :  { %v2985_v52 = vpop.eup %2984 }
 0x346   :  { %v1789_v58 = vsel %vm681_vm2, %v2985_v52, 0 }
 0x347   :  { %v1857_v1 = vand.u32 4294901760, %v1789_v58 }
 0x349   :  { %v1858_v60 = vsub.f32 %v1789_v58, %v1857_v1  ;;  %2957 = vmatmul.mubr.f32.vlgmr.msra.gmra.mxu1 %v1857_v1 }
 0x34a   :  { %2965 = vmatpush3.msra.mxu1 %v3516_v42  ;;  %2966 = vmatprep.mubr.msk.f32.mxu1 %vm3009_vm0, %v3862_v39 }
 0x34b   :  { %v1859_v49 = vand.u32 4294901760, %v1858_v60  ;;  %2974 = vmatprep.subr.mxu1 %v3862_v39 }
 0x34d   :  { %2967 = vmatmul.mubr.f32.vlgmr.msra.gmra.mxu1 %v1859_v49  ;;  %v1860_v36 = vsub.f32 %v1858_v60, %v1859_v49 }
 0x34e   :  { %2975 = vmatpush3.msra.mxu1 %v3516_v42  ;;  %2976 = vmatprep.mubr.msk.f32.mxu1 %vm3009_vm0, %v3862_v39 }
 0x34f   :  { %v1861_v14 = vand.u32 4294901760, %v1860_v36 }
 0x351   :  { %2952 = vmatmul.mubr.f32.vlgmr.msra.gmra.mxu0 %v1861_v14  ;;  %2977 = vmatmul.mubr.f32.vlgmr.msra.gmra.mxu1 %v1857_v1 }
 0x352   :  { %2960 = vmatpush3.msra.mxu0 %v3519_v9  ;;  %2961 = vmatprep.mubr.msk.f32.mxu0 %vm3009_vm0, %v3862_v39 }
 0x353   :  { %2969 = vmatprep.subr.mxu0 %v3862_v39 }
 0x355   :  { %2962 = vmatmul.mubr.f32.vlgmr.msra.gmra.mxu0 %v1858_v60 }
 0x356   :  { %2970 = vmatpush3.msra.mxu0 %v3524_v62  ;;  %2971 = vmatprep.mubr.msk.f32.mxu0 %vm3009_vm0, %v3862_v39  ;;  %v2269_v39 = vld [vmem:[%s3803_s1] ss:$0 sm:$0xff] }
 0x359   :  { %2972 = vmatmul.mubr.f32.vlgmr.msra.gmra.mxu0 %v1857_v1 }
 0x409   :  { %v1939_v42 = vpop.f32.mrf.mxu1 }
 0x40b   :  { %v2958_v33 = vpop.f32.mrf.mxu1 }
 0x40d   :  { %v2087_v0 = vpop.f32.mrf.mxu1 }
 0x40f   :  { %v2968_v26 = vpop.f32.mrf.mxu1 }
 0x411   :  { %v1863_v51 = vpop.f32.mrf.mxu0  ;;  %v2233_v7 = vpop.f32.mrf.mxu1 }
 0x412   :  { %v1940_v24 = vadd.f32 %v1939_v42, %v1863_v51 }
 0x413   :  { %v2953_v29 = vpop.f32.mrf.mxu0  ;;  %v2978_v9 = vpop.f32.mrf.mxu1 }
 0x415   :  { %v2013_v3 = vpop.f32.mrf.mxu0 }
 0x416   :  { %v2014_v22 = vadd.f32 %v2013_v3, %v1940_v24 }
 0x417   :  { %v2963_v23 = vpop.f32.mrf.mxu0 }
 0x418   :  { %v2088_v27 = vadd.f32 %v2087_v0, %v2014_v22 }
 0x419   :  { %v2161_v4 = vpop.f32.mrf.mxu0 }
 0x41a   :  { %v2162_v5 = vadd.f32 %v2161_v4, %v2088_v27 }
 0x41b   :  { %v2973_v62 = vpop.f32.mrf.mxu0 }
 0x41c   :  { %v2234_v6 = vadd.f32 %v2233_v7, %v2162_v5 }
 0x41e   :  { %v2239_v10 = vmul.f32 %v2234_v6, %v3618_v2 }
 0x420   :  { %v2246_v12 = vmul.f32 %v2269_v39, %v2239_v10 }
 0x422   :  { %v2253_v15 = vadd.f32 %v2270_v11, %v2246_v12 }
 0x424   :  { %2254 = vst [vmem:[#allocation2] sm:$0xf] %v2253_v15 }
 0x425   :  { %2997 = shalt.err (!%p2994_p4)
}
 0x426   :  { %2264 = dma.vmem_to_hbm [thread:$0]  %s2262_s6, 64, %s3807_s5, [#allocation3]  }
 0x427   :  { %3006 = dma.done.wait [#allocation3], 64  }
 0x428   :  { %3007 = vsyncadd [#allocation3], 4294967232 }
 0x429   :  { %2268 = vsyncpa [#allocation3], 1 }

</bundles_post_ra>
